<compile_context>
chip_gen: v7x
topology: tpu7x:2x2x1
jax: 0.10.0
libtpu: 0.0.40
codegen_flags: <defaults>
</compile_context>

<pallas_src>
import jax
import jax.numpy as jnp
from jax.experimental import pallas as pl
from jax.experimental.pallas import tpu as pltpu


_MISH_X_CLAMP = 20.0


def _mish_f32(x):
    """mish(x) = x * tanh(softplus(x)) with a single EUP exp.

    tanh(log(1+e)) = e*(e+2) / (e*(e+2) + 2), so only one exp and one
    approximate reciprocal hit the single-slot EUP; a Newton step on the VPU
    restores ~f32 accuracy.  x is clamped before exp (mish(x) ~= x there).
    """
    xc = jnp.minimum(x, _MISH_X_CLAMP)
    e = jnp.exp(xc)
    num = e * (e + 2.0)
    den = num + 2.0
    r = pl.reciprocal(den, approx=True)
    r = r * (2.0 - den * r)          # Newton refinement (VPU, which has slack)
    return jnp.where(x > _MISH_X_CLAMP, x, x * (num * r))


def resblock_kernel(x_ref, halo_ref, w1_ref, b1_ref, w2_ref, b2_ref, o_ref):
    # x_ref:    (Cin, TL)  current L-tile; channels on sublanes, L on lanes.
    # halo_ref: (Cin, 4)   x columns [l*TL-2, l*TL-1, (l+1)*TL, (l+1)*TL+1]
    #                      (zeros outside the true sequence).
    # w1_ref:   (3, Ch, Cin) per-tap conv1 weights;  b1_ref: (Ch, 1)  f32.
    # w2_ref:   (3, Cin, Ch) per-tap conv2 weights;  b2_ref: (Cin, 1) f32.
    # o_ref:    (Cin, TL)  lane-dense output tile.
    _, tl = x_ref.shape
    l = pl.program_id(1)
    last_l = pl.num_programs(1) - 1

    cdt = w1_ref.dtype                       # matmul operand dtype (bf16-friendly)
    x = x_ref[...]
    xc = x.astype(cdt)
    halo = halo_ref[...].astype(cdt)

    col = jax.lax.broadcasted_iota(jnp.int32, (1, tl), 1)
    first_col = col == 0
    last_col = col == tl - 1

    # Lane-aligned +-1 shifted views of the tile: XLU roll + 1-column halo fix.
    x_m1 = jnp.where(first_col, halo[:, 1:2], pltpu.roll(xc, 1, axis=1))
    x_p1 = jnp.where(last_col, halo[:, 2:3], pltpu.roll(xc, tl - 1, axis=1))

    # conv1 over the tile: 3 per-tap dots (K=Cin, N=TL), accumulated in f32.
    h = jnp.dot(w1_ref[0], x_m1, preferred_element_type=jnp.float32)
    h = h + jnp.dot(w1_ref[1], xc, preferred_element_type=jnp.float32)
    h = h + jnp.dot(w1_ref[2], x_p1, preferred_element_type=jnp.float32)
    h = h + b1_ref[...]
    m = _mish_f32(h).astype(cdt)                                  # (Ch, TL)

    # conv1 at the two columns just outside the tile (needed by conv2's +-1
    # taps): tiny K=Cin, N=2 dots on the halo columns only, so the big matmuls
    # above stay exactly TL (a multiple of 128) wide.
    tap0 = jnp.concatenate([halo[:, 0:1], xc[:, tl - 1:tl]], axis=1)  # [x_-2 | x_{TL-1}]
    tap1 = halo[:, 1:3]                                               # [x_-1 | x_{TL}  ]
    tap2 = jnp.concatenate([xc[:, 0:1], halo[:, 3:4]], axis=1)        # [x_0  | x_{TL+1}]
    hh = jnp.dot(w1_ref[0], tap0, preferred_element_type=jnp.float32)
    hh = hh + jnp.dot(w1_ref[1], tap1, preferred_element_type=jnp.float32)
    hh = hh + jnp.dot(w1_ref[2], tap2, preferred_element_type=jnp.float32)
    hh = hh + b1_ref[...]
    mh = _mish_f32(hh)                                            # (Ch, 2)

    # conv2's zero padding exists only at the TRUE sequence ends; interior tile
    # boundaries use the real neighbour activations.
    col2 = jax.lax.broadcasted_iota(jnp.int32, (1, 2), 1)
    keep = jnp.logical_and(jnp.logical_or(col2 != 0, l != 0),
                           jnp.logical_or(col2 != 1, l != last_l))
    mh = jnp.where(keep, mh, 0.0).astype(cdt)

    # conv2 + residual + mish, again on lane-aligned width-TL operands.
    m_m1 = jnp.where(first_col, mh[:, 0:1], pltpu.roll(m, 1, axis=1))
    m_p1 = jnp.where(last_col, mh[:, 1:2], pltpu.roll(m, tl - 1, axis=1))
    y = jnp.dot(w2_ref[0], m_m1, preferred_element_type=jnp.float32)
    y = y + jnp.dot(w2_ref[1], m, preferred_element_type=jnp.float32)
    y = y + jnp.dot(w2_ref[2], m_p1, preferred_element_type=jnp.float32)
    y = y + b2_ref[...] + x.astype(jnp.float32)
    o_ref[...] = _mish_f32(y).astype(o_ref.dtype)


def _choose_tile_l(L, cmax):
    """Largest L-tile (a multiple of 128 that divides L, or L itself) whose
    biggest (C, TL) f32 plane stays <= ~2 MiB, so a handful of live copies
    plus double-buffered in/out blocks fit comfortably even in v7x's 64 MiB."""
    budget = 2 * 1024 * 1024

    def ok(t):
        return cmax * t * 4 <= budget

    if ok(L):
        return L
    cands = [t for t in range(128, L, 128) if L % t == 0]
    good = [t for t in cands if ok(t)]
    if good:
        return max(good)
    return min(cands) if cands else L


def _vmem_limit_bytes():
    """Chip-aware scoped-VMEM limit: ~3/4 of capacity, capped at 96 MiB
    (v5e/v6e: 96 MiB, v7x: 48 MiB, unknown: 48 MiB)."""
    try:
        cap = int(pltpu.get_tpu_info().vmem_capacity_bytes)
    except Exception:
        cap = 64 * 1024 * 1024
    return min(cap * 3 // 4, 96 * 1024 * 1024)


def resblock_forward(x_ncl, w1, b1, w2, b2, *, tile_l=None, matmul_dtype=None):
    """Fused ResBlock forward.

    x_ncl: (N, Cin, L) PyTorch NCL input (kept; no transposes of activations).
    w1: (Ch, Cin, 3), b1: (Ch,), w2: (Cin, Ch, 3), b2: (Cin,).
    matmul_dtype: optional dtype (e.g. jnp.bfloat16) for matmul operands only;
                  bias / residual / mish stay in f32.
    """
    N, Cin, L = x_ncl.shape
    Ch = w1.shape[0]

    if tile_l is None:
        tile_l = _choose_tile_l(L, max(Cin, Ch))
    if L % tile_l != 0:
        tile_l = L
    num_l = L // tile_l

    cdt = jnp.dtype(matmul_dtype) if matmul_dtype is not None else x_ncl.dtype
    # Per-tap weight planes (3, Cout, Cin_k): tap k multiplies x[:, t-1+k].
    w1_t = jnp.transpose(w1, (2, 0, 1)).astype(cdt)     # (3, Ch, Cin)
    w2_t = jnp.transpose(w2, (2, 0, 1)).astype(cdt)     # (3, Cin, Ch)
    b1_col = b1.reshape(Ch, 1).astype(jnp.float32)
    b2_col = b2.reshape(Cin, 1).astype(jnp.float32)

    # Merged halo side input: for tile l the 4 x-columns
    #   [l*TL-2, l*TL-1, (l+1)*TL, (l+1)*TL+1]
    # gathered from narrow boundary slices (no full-array pads), zero at the
    # true sequence ends.  Shape (N, num_l, Cin, 4) -> one tiny DMA per step.
    xt = x_ncl.reshape(N, Cin, num_l, tile_l)
    zero2 = jnp.zeros((N, Cin, 1, 2), x_ncl.dtype)
    last2 = xt[:, :, :, tile_l - 2:]        # cols TL-2, TL-1 of every tile
    first2 = xt[:, :, :, :2]                # cols 0, 1 of every tile
    lh = jnp.concatenate([zero2, last2[:, :, :num_l - 1, :]], axis=2)
    rh = jnp.concatenate([first2[:, :, 1:, :], zero2], axis=2)
    halo = jnp.transpose(jnp.concatenate([lh, rh], axis=3), (0, 2, 1, 3))

    return pl.pallas_call(
        resblock_kernel,
        out_shape=jax.ShapeDtypeStruct((N, Cin, L), x_ncl.dtype),
        grid_spec=pltpu.PrefetchScalarGridSpec(
            num_scalar_prefetch=0,
            grid=(N, num_l),
            in_specs=[
                pl.BlockSpec((None, Cin, tile_l), lambda n, l: (n, 0, l)),
                pl.BlockSpec((None, None, Cin, 4), lambda n, l: (n, l, 0, 0)),
                pl.BlockSpec((3, Ch, Cin), lambda n, l: (0, 0, 0)),
                pl.BlockSpec((Ch, 1), lambda n, l: (0, 0)),
                pl.BlockSpec((3, Cin, Ch), lambda n, l: (0, 0, 0)),
                pl.BlockSpec((Cin, 1), lambda n, l: (0, 0)),
            ],
            out_specs=pl.BlockSpec((None, Cin, tile_l), lambda n, l: (n, 0, l)),
        ),
        compiler_params=pltpu.CompilerParams(
            dimension_semantics=("parallel", "parallel"),
            vmem_limit_bytes=_vmem_limit_bytes(),
        ),
    )(x_ncl, halo, w1_t, b1_col, w2_t, b2_col)


def _reference_forward(x_ncl, w1, b1, w2, b2):
    """Pure-JAX reference of the PyTorch ResBlock.forward (NCL layout)."""
    def conv1d(x, w, b):
        y = jax.lax.conv_general_dilated(
            x, w, window_strides=(1,), padding=[(1, 1)],
            dimension_numbers=("NCH", "OIH", "NCH"))
        return y + b[None, :, None]

    def mish(x):
        return x * jnp.tanh(jax.nn.softplus(x))

    h = mish(conv1d(x_ncl, w1, b1))
    h = conv1d(h, w2, b2) + x_ncl
    return mish(h)


if __name__ == "__main__":
    # Small shapes consistent with the module (Conv1d expects (N, C, L)).
    # L=256 with tile_l=128 exercises the multi-tile halo path at tiny size.
    N, Cin, Ch, L = 2, 4, 8, 256

    key = jax.random.PRNGKey(0)
    k_x, k_w1, k_b1, k_w2, k_b2 = jax.random.split(key, 5)

    x = jax.random.normal(k_x, (N, Cin, L), dtype=jnp.float32)

    # Deterministic parameter init (uniform, PyTorch-Conv1d-like bounds).
    bound1 = 1.0 / (Cin * 3) ** 0.5
    w1 = jax.random.uniform(k_w1, (Ch, Cin, 3), minval=-bound1, maxval=bound1,
                            dtype=jnp.float32)
    b1 = jax.random.uniform(k_b1, (Ch,), minval=-bound1, maxval=bound1,
                            dtype=jnp.float32)
    bound2 = 1.0 / (Ch * 3) ** 0.5
    w2 = jax.random.uniform(k_w2, (Cin, Ch, 3), minval=-bound2, maxval=bound2,
                            dtype=jnp.float32)
    b2 = jax.random.uniform(k_b2, (Cin,), minval=-bound2, maxval=bound2,
                            dtype=jnp.float32)

    ref = _reference_forward(x, w1, b1, w2, b2)

    # Multi-tile path: exercises roll+halo handling across interior boundaries.
    out_tiled = jax.block_until_ready(resblock_forward(x, w1, b1, w2, b2, tile_l=128))
    assert out_tiled.shape == (N, Cin, L)
    assert jnp.allclose(out_tiled, ref, atol=1e-4, rtol=1e-4), "tiled mismatch vs reference"

    # Default tile selection (single large lane-dense tile for this config).
    out_full = jax.block_until_ready(resblock_forward(x, w1, b1, w2, b2))
    assert jnp.allclose(out_full, ref, atol=1e-4, rtol=1e-4), "full-tile mismatch vs reference"

    print("KERNEL_OK")
</pallas_src>

<mosaic_0001>
module attributes {stable_mosaic.version = 11 : i64} {
  func.func @resblock_kernel(%arg0: i32, %arg1: i32, %arg2: memref<1x4x128xf32, #tpu.memory_space<vmem>>, %arg3: memref<1x1x4x4xf32, #tpu.memory_space<vmem>>, %arg4: memref<3x8x4xf32, #tpu.memory_space<vmem>>, %arg5: memref<8x1xf32, #tpu.memory_space<vmem>>, %arg6: memref<3x4x8xf32, #tpu.memory_space<vmem>>, %arg7: memref<4x1xf32, #tpu.memory_space<vmem>>, %arg8: memref<1x4x128xf32, #tpu.memory_space<vmem>>) attributes {dimension_semantics = [#tpu.dimension_semantics<parallel>, #tpu.dimension_semantics<parallel>], iteration_bounds = array<i64: 2, 2>, scalar_prefetch = 0 : i64, scratch_operands = 0 : i64, tpu.core_type = #tpu.core_type<tc>, window_params = [{transform_indices = @transform_0, window_bounds = array<i64: 1, 4, 128>}, {transform_indices = @transform_1, window_bounds = array<i64: 1, 1, 4, 4>}, {pipeline_mode = #tpu.pipeline_mode<synchronous>, transform_indices = @transform_2, window_bounds = array<i64: 3, 8, 4>}, {pipeline_mode = #tpu.pipeline_mode<synchronous>, transform_indices = @transform_3, window_bounds = array<i64: 8, 1>}, {pipeline_mode = #tpu.pipeline_mode<synchronous>, transform_indices = @transform_4, window_bounds = array<i64: 3, 4, 8>}, {pipeline_mode = #tpu.pipeline_mode<synchronous>, transform_indices = @transform_5, window_bounds = array<i64: 4, 1>}, {transform_indices = @transform_6, window_bounds = array<i64: 1, 4, 128>}]} {
    %c0 = arith.constant 0 : index
    %c0_0 = arith.constant 0 : index
    %c0_1 = arith.constant 0 : index
    %0 = vector.load %arg2[%c0, %c0_0, %c0_1] : memref<1x4x128xf32, #tpu.memory_space<vmem>>, vector<1x4x128xf32>
    %1 = vector.shape_cast %0 : vector<1x4x128xf32> to vector<4x128xf32>
    %c0_2 = arith.constant 0 : index
    %c0_3 = arith.constant 0 : index
    %c0_4 = arith.constant 0 : index
    %c0_5 = arith.constant 0 : index
    %2 = vector.load %arg3[%c0_2, %c0_3, %c0_4, %c0_5] : memref<1x1x4x4xf32, #tpu.memory_space<vmem>>, vector<1x1x4x4xf32>
    %3 = vector.shape_cast %2 : vector<1x1x4x4xf32> to vector<4x4xf32>
    %4 = tpu.iota {dimensions = array<i32: 1>} : vector<1x128xi32>
    %c0_i32 = arith.constant 0 : i32
    %5 = vector.broadcast %c0_i32 : i32 to vector<1x128xi32>
    %6 = arith.cmpi eq, %4, %5 : vector<1x128xi32>
    %c127_i32 = arith.constant 127 : i32
    %7 = vector.broadcast %c127_i32 : i32 to vector<1x128xi32>
    %8 = arith.cmpi eq, %4, %7 : vector<1x128xi32>
    %9 = vector.extract_strided_slice %3 {offsets = [0, 1], sizes = [4, 1], strides = [1, 1]} : vector<4x4xf32> to vector<4x1xf32>
    %c1_i32 = arith.constant 1 : i32
    %10 = tpu.dynamic_rotate %1 by %c1_i32 dim 1 : vector<4x128xf32>, i32 -> vector<4x128xf32>
    %11 = vector.shape_cast %6 : vector<1x128xi1> to vector<1x128xi1>
    %12 = vector.broadcast %11 : vector<1x128xi1> to vector<4x128xi1>
    %13 = vector.shape_cast %9 : vector<4x1xf32> to vector<4x1xf32>
    %14 = vector.broadcast %13 : vector<4x1xf32> to vector<4x128xf32>
    %15 = arith.select %12, %14, %10 : vector<4x128xi1>, vector<4x128xf32>
    %16 = vector.extract_strided_slice %3 {offsets = [0, 2], sizes = [4, 1], strides = [1, 1]} : vector<4x4xf32> to vector<4x1xf32>
    %c127_i32_6 = arith.constant 127 : i32
    %17 = tpu.dynamic_rotate %1 by %c127_i32_6 dim 1 : vector<4x128xf32>, i32 -> vector<4x128xf32>
    %18 = vector.shape_cast %8 : vector<1x128xi1> to vector<1x128xi1>
    %19 = vector.broadcast %18 : vector<1x128xi1> to vector<4x128xi1>
    %20 = vector.shape_cast %16 : vector<4x1xf32> to vector<4x1xf32>
    %21 = vector.broadcast %20 : vector<4x1xf32> to vector<4x128xf32>
    %22 = arith.select %19, %21, %17 : vector<4x128xi1>, vector<4x128xf32>
    %c0_7 = arith.constant 0 : index
    %c0_8 = arith.constant 0 : index
    %c0_9 = arith.constant 0 : index
    %23 = vector.load %arg4[%c0_7, %c0_8, %c0_9] : memref<3x8x4xf32, #tpu.memory_space<vmem>>, vector<1x8x4xf32>
    %24 = vector.shape_cast %23 : vector<1x8x4xf32> to vector<8x4xf32>
    %cst = arith.constant dense<0.000000e+00> : vector<8x128xf32>
    %25 = tpu.matmul %24, %15, %cst {dimension_numbers = #tpu.dot_dimension_numbers<[1], [0], [0], [1], [0, 0, 1, 1], [], []>} : vector<8x4xf32>, vector<4x128xf32>, vector<8x128xf32> -> vector<8x128xf32>
    %c1 = arith.constant 1 : index
    %c0_10 = arith.constant 0 : index
    %c0_11 = arith.constant 0 : index
    %26 = vector.load %arg4[%c1, %c0_10, %c0_11] : memref<3x8x4xf32, #tpu.memory_space<vmem>>, vector<1x8x4xf32>
    %27 = vector.shape_cast %26 : vector<1x8x4xf32> to vector<8x4xf32>
    %cst_12 = arith.constant dense<0.000000e+00> : vector<8x128xf32>
    %28 = tpu.matmul %27, %1, %cst_12 {dimension_numbers = #tpu.dot_dimension_numbers<[1], [0], [0], [1], [0, 0, 1, 1], [], []>} : vector<8x4xf32>, vector<4x128xf32>, vector<8x128xf32> -> vector<8x128xf32>
    %29 = arith.addf %25, %28 : vector<8x128xf32>
    %c2 = arith.constant 2 : index
    %c0_13 = arith.constant 0 : index
    %c0_14 = arith.constant 0 : index
    %30 = vector.load %arg4[%c2, %c0_13, %c0_14] : memref<3x8x4xf32, #tpu.memory_space<vmem>>, vector<1x8x4xf32>
    %31 = vector.shape_cast %30 : vector<1x8x4xf32> to vector<8x4xf32>
    %cst_15 = arith.constant dense<0.000000e+00> : vector<8x128xf32>
    %32 = tpu.matmul %31, %22, %cst_15 {dimension_numbers = #tpu.dot_dimension_numbers<[1], [0], [0], [1], [0, 0, 1, 1], [], []>} : vector<8x4xf32>, vector<4x128xf32>, vector<8x128xf32> -> vector<8x128xf32>
    %33 = arith.addf %29, %32 : vector<8x128xf32>
    %c0_16 = arith.constant 0 : index
    %c0_17 = arith.constant 0 : index
    %34 = vector.load %arg5[%c0_16, %c0_17] : memref<8x1xf32, #tpu.memory_space<vmem>>, vector<8x1xf32>
    %35 = vector.broadcast %34 : vector<8x1xf32> to vector<8x128xf32>
    %36 = arith.addf %33, %35 : vector<8x128xf32>
    %cst_18 = arith.constant 2.000000e+01 : f32
    %37 = vector.broadcast %cst_18 : f32 to vector<8x128xf32>
    %38 = arith.minimumf %36, %37 : vector<8x128xf32>
    %39 = math.exp %38 : vector<8x128xf32>
    %cst_19 = arith.constant 2.000000e+00 : f32
    %40 = vector.broadcast %cst_19 : f32 to vector<8x128xf32>
    %41 = arith.addf %39, %40 : vector<8x128xf32>
    %42 = arith.mulf %39, %41 : vector<8x128xf32>
    %cst_20 = arith.constant 2.000000e+00 : f32
    %43 = vector.broadcast %cst_20 : f32 to vector<8x128xf32>
    %44 = arith.addf %42, %43 : vector<8x128xf32>
    %45 = tpu.reciprocal %44 {approx = true} : vector<8x128xf32> -> vector<8x128xf32>
    %46 = arith.mulf %44, %45 : vector<8x128xf32>
    %cst_21 = arith.constant 2.000000e+00 : f32
    %47 = vector.broadcast %cst_21 : f32 to vector<8x128xf32>
    %48 = arith.subf %47, %46 : vector<8x128xf32>
    %49 = arith.mulf %45, %48 : vector<8x128xf32>
    %cst_22 = arith.constant 2.000000e+01 : f32
    %50 = vector.broadcast %cst_22 : f32 to vector<8x128xf32>
    %51 = arith.cmpf ogt, %36, %50 : vector<8x128xf32>
    %52 = arith.mulf %42, %49 : vector<8x128xf32>
    %53 = arith.mulf %36, %52 : vector<8x128xf32>
    %54 = arith.select %51, %36, %53 : vector<8x128xi1>, vector<8x128xf32>
    %55 = vector.extract_strided_slice %3 {offsets = [0, 0], sizes = [4, 1], strides = [1, 1]} : vector<4x4xf32> to vector<4x1xf32>
    %56 = vector.extract_strided_slice %1 {offsets = [0, 127], sizes = [4, 1], strides = [1, 1]} : vector<4x128xf32> to vector<4x1xf32>
    %57 = tpu.concatenate %55, %56 in 1 : vector<4x1xf32>, vector<4x1xf32> -> vector<4x2xf32>
    %58 = vector.extract_strided_slice %3 {offsets = [0, 1], sizes = [4, 2], strides = [1, 1]} : vector<4x4xf32> to vector<4x2xf32>
    %59 = vector.extract_strided_slice %1 {offsets = [0, 0], sizes = [4, 1], strides = [1, 1]} : vector<4x128xf32> to vector<4x1xf32>
    %60 = vector.extract_strided_slice %3 {offsets = [0, 3], sizes = [4, 1], strides = [1, 1]} : vector<4x4xf32> to vector<4x1xf32>
    %61 = tpu.concatenate %59, %60 in 1 : vector<4x1xf32>, vector<4x1xf32> -> vector<4x2xf32>
    %c0_23 = arith.constant 0 : index
    %c0_24 = arith.constant 0 : index
    %c0_25 = arith.constant 0 : index
    %62 = vector.load %arg4[%c0_23, %c0_24, %c0_25] : memref<3x8x4xf32, #tpu.memory_space<vmem>>, vector<1x8x4xf32>
    %63 = vector.shape_cast %62 : vector<1x8x4xf32> to vector<8x4xf32>
    %cst_26 = arith.constant dense<0.000000e+00> : vector<8x2xf32>
    %64 = tpu.matmul %63, %57, %cst_26 {dimension_numbers = #tpu.dot_dimension_numbers<[1], [0], [0], [1], [0, 0, 1, 1], [], []>} : vector<8x4xf32>, vector<4x2xf32>, vector<8x2xf32> -> vector<8x2xf32>
    %c1_27 = arith.constant 1 : index
    %c0_28 = arith.constant 0 : index
    %c0_29 = arith.constant 0 : index
    %65 = vector.load %arg4[%c1_27, %c0_28, %c0_29] : memref<3x8x4xf32, #tpu.memory_space<vmem>>, vector<1x8x4xf32>
    %66 = vector.shape_cast %65 : vector<1x8x4xf32> to vector<8x4xf32>
    %cst_30 = arith.constant dense<0.000000e+00> : vector<8x2xf32>
    %67 = tpu.matmul %66, %58, %cst_30 {dimension_numbers = #tpu.dot_dimension_numbers<[1], [0], [0], [1], [0, 0, 1, 1], [], []>} : vector<8x4xf32>, vector<4x2xf32>, vector<8x2xf32> -> vector<8x2xf32>
    %68 = arith.addf %64, %67 : vector<8x2xf32>
    %c2_31 = arith.constant 2 : index
    %c0_32 = arith.constant 0 : index
    %c0_33 = arith.constant 0 : index
    %69 = vector.load %arg4[%c2_31, %c0_32, %c0_33] : memref<3x8x4xf32, #tpu.memory_space<vmem>>, vector<1x8x4xf32>
    %70 = vector.shape_cast %69 : vector<1x8x4xf32> to vector<8x4xf32>
    %cst_34 = arith.constant dense<0.000000e+00> : vector<8x2xf32>
    %71 = tpu.matmul %70, %61, %cst_34 {dimension_numbers = #tpu.dot_dimension_numbers<[1], [0], [0], [1], [0, 0, 1, 1], [], []>} : vector<8x4xf32>, vector<4x2xf32>, vector<8x2xf32> -> vector<8x2xf32>
    %72 = arith.addf %68, %71 : vector<8x2xf32>
    %c0_35 = arith.constant 0 : index
    %c0_36 = arith.constant 0 : index
    %73 = vector.load %arg5[%c0_35, %c0_36] : memref<8x1xf32, #tpu.memory_space<vmem>>, vector<8x1xf32>
    %74 = vector.broadcast %73 : vector<8x1xf32> to vector<8x2xf32>
    %75 = arith.addf %72, %74 : vector<8x2xf32>
    %cst_37 = arith.constant 2.000000e+01 : f32
    %76 = vector.broadcast %cst_37 : f32 to vector<8x2xf32>
    %77 = arith.minimumf %75, %76 : vector<8x2xf32>
    %78 = math.exp %77 : vector<8x2xf32>
    %cst_38 = arith.constant 2.000000e+00 : f32
    %79 = vector.broadcast %cst_38 : f32 to vector<8x2xf32>
    %80 = arith.addf %78, %79 : vector<8x2xf32>
    %81 = arith.mulf %78, %80 : vector<8x2xf32>
    %cst_39 = arith.constant 2.000000e+00 : f32
    %82 = vector.broadcast %cst_39 : f32 to vector<8x2xf32>
    %83 = arith.addf %81, %82 : vector<8x2xf32>
    %84 = tpu.reciprocal %83 {approx = true} : vector<8x2xf32> -> vector<8x2xf32>
    %85 = arith.mulf %83, %84 : vector<8x2xf32>
    %cst_40 = arith.constant 2.000000e+00 : f32
    %86 = vector.broadcast %cst_40 : f32 to vector<8x2xf32>
    %87 = arith.subf %86, %85 : vector<8x2xf32>
    %88 = arith.mulf %84, %87 : vector<8x2xf32>
    %cst_41 = arith.constant 2.000000e+01 : f32
    %89 = vector.broadcast %cst_41 : f32 to vector<8x2xf32>
    %90 = arith.cmpf ogt, %75, %89 : vector<8x2xf32>
    %91 = arith.mulf %81, %88 : vector<8x2xf32>
    %92 = arith.mulf %75, %91 : vector<8x2xf32>
    %93 = arith.select %90, %75, %92 : vector<8x2xi1>, vector<8x2xf32>
    %94 = tpu.iota {dimensions = array<i32: 1>} : vector<1x2xi32>
    %c0_i32_42 = arith.constant 0 : i32
    %95 = vector.broadcast %c0_i32_42 : i32 to vector<1x2xi32>
    %96 = arith.cmpi ne, %94, %95 : vector<1x2xi32>
    %c0_i32_43 = arith.constant 0 : i32
    %97 = arith.cmpi ne, %arg1, %c0_i32_43 : i32
    %98 = vector.broadcast %97 : i1 to vector<1x2xi1>
    %99 = arith.ori %96, %98 : vector<1x2xi1>
    %c1_i32_44 = arith.constant 1 : i32
    %100 = vector.broadcast %c1_i32_44 : i32 to vector<1x2xi32>
    %101 = arith.cmpi ne, %94, %100 : vector<1x2xi32>
    %c1_i32_45 = arith.constant 1 : i32
    %102 = arith.cmpi ne, %arg1, %c1_i32_45 : i32
    %103 = vector.broadcast %102 : i1 to vector<1x2xi1>
    %104 = arith.ori %101, %103 : vector<1x2xi1>
    %105 = arith.andi %99, %104 : vector<1x2xi1>
    %cst_46 = arith.constant 0.000000e+00 : f32
    %106 = vector.shape_cast %105 : vector<1x2xi1> to vector<1x2xi1>
    %107 = vector.broadcast %106 : vector<1x2xi1> to vector<8x2xi1>
    %108 = vector.broadcast %cst_46 : f32 to vector<8x2xf32>
    %109 = arith.select %107, %93, %108 : vector<8x2xi1>, vector<8x2xf32>
    %110 = vector.extract_strided_slice %109 {offsets = [0, 0], sizes = [8, 1], strides = [1, 1]} : vector<8x2xf32> to vector<8x1xf32>
    %c1_i32_47 = arith.constant 1 : i32
    %111 = tpu.dynamic_rotate %54 by %c1_i32_47 dim 1 : vector<8x128xf32>, i32 -> vector<8x128xf32>
    %112 = vector.shape_cast %6 : vector<1x128xi1> to vector<1x128xi1>
    %113 = vector.broadcast %112 : vector<1x128xi1> to vector<8x128xi1>
    %114 = vector.shape_cast %110 : vector<8x1xf32> to vector<8x1xf32>
    %115 = vector.broadcast %114 : vector<8x1xf32> to vector<8x128xf32>
    %116 = arith.select %113, %115, %111 : vector<8x128xi1>, vector<8x128xf32>
    %117 = vector.extract_strided_slice %109 {offsets = [0, 1], sizes = [8, 1], strides = [1, 1]} : vector<8x2xf32> to vector<8x1xf32>
    %c127_i32_48 = arith.constant 127 : i32
    %118 = tpu.dynamic_rotate %54 by %c127_i32_48 dim 1 : vector<8x128xf32>, i32 -> vector<8x128xf32>
    %119 = vector.shape_cast %8 : vector<1x128xi1> to vector<1x128xi1>
    %120 = vector.broadcast %119 : vector<1x128xi1> to vector<8x128xi1>
    %121 = vector.shape_cast %117 : vector<8x1xf32> to vector<8x1xf32>
    %122 = vector.broadcast %121 : vector<8x1xf32> to vector<8x128xf32>
    %123 = arith.select %120, %122, %118 : vector<8x128xi1>, vector<8x128xf32>
    %c0_49 = arith.constant 0 : index
    %c0_50 = arith.constant 0 : index
    %c0_51 = arith.constant 0 : index
    %124 = vector.load %arg6[%c0_49, %c0_50, %c0_51] : memref<3x4x8xf32, #tpu.memory_space<vmem>>, vector<1x4x8xf32>
    %125 = vector.shape_cast %124 : vector<1x4x8xf32> to vector<4x8xf32>
    %cst_52 = arith.constant dense<0.000000e+00> : vector<4x128xf32>
    %126 = tpu.matmul %125, %116, %cst_52 {dimension_numbers = #tpu.dot_dimension_numbers<[1], [0], [0], [1], [0, 0, 1, 1], [], []>} : vector<4x8xf32>, vector<8x128xf32>, vector<4x128xf32> -> vector<4x128xf32>
    %c1_53 = arith.constant 1 : index
    %c0_54 = arith.constant 0 : index
    %c0_55 = arith.constant 0 : index
    %127 = vector.load %arg6[%c1_53, %c0_54, %c0_55] : memref<3x4x8xf32, #tpu.memory_space<vmem>>, vector<1x4x8xf32>
    %128 = vector.shape_cast %127 : vector<1x4x8xf32> to vector<4x8xf32>
    %cst_56 = arith.constant dense<0.000000e+00> : vector<4x128xf32>
    %129 = tpu.matmul %128, %54, %cst_56 {dimension_numbers = #tpu.dot_dimension_numbers<[1], [0], [0], [1], [0, 0, 1, 1], [], []>} : vector<4x8xf32>, vector<8x128xf32>, vector<4x128xf32> -> vector<4x128xf32>
    %130 = arith.addf %126, %129 : vector<4x128xf32>
    %c2_57 = arith.constant 2 : index
    %c0_58 = arith.constant 0 : index
    %c0_59 = arith.constant 0 : index
    %131 = vector.load %arg6[%c2_57, %c0_58, %c0_59] : memref<3x4x8xf32, #tpu.memory_space<vmem>>, vector<1x4x8xf32>
    %132 = vector.shape_cast %131 : vector<1x4x8xf32> to vector<4x8xf32>
    %cst_60 = arith.constant dense<0.000000e+00> : vector<4x128xf32>
    %133 = tpu.matmul %132, %123, %cst_60 {dimension_numbers = #tpu.dot_dimension_numbers<[1], [0], [0], [1], [0, 0, 1, 1], [], []>} : vector<4x8xf32>, vector<8x128xf32>, vector<4x128xf32> -> vector<4x128xf32>
    %134 = arith.addf %130, %133 : vector<4x128xf32>
    %c0_61 = arith.constant 0 : index
    %c0_62 = arith.constant 0 : index
    %135 = vector.load %arg7[%c0_61, %c0_62] : memref<4x1xf32, #tpu.memory_space<vmem>>, vector<4x1xf32>
    %136 = vector.broadcast %135 : vector<4x1xf32> to vector<4x128xf32>
    %137 = arith.addf %134, %136 : vector<4x128xf32>
    %138 = arith.addf %137, %1 : vector<4x128xf32>
    %cst_63 = arith.constant 2.000000e+01 : f32
    %139 = vector.broadcast %cst_63 : f32 to vector<4x128xf32>
    %140 = arith.minimumf %138, %139 : vector<4x128xf32>
    %141 = math.exp %140 : vector<4x128xf32>
    %cst_64 = arith.constant 2.000000e+00 : f32
    %142 = vector.broadcast %cst_64 : f32 to vector<4x128xf32>
    %143 = arith.addf %141, %142 : vector<4x128xf32>
    %144 = arith.mulf %141, %143 : vector<4x128xf32>
    %cst_65 = arith.constant 2.000000e+00 : f32
    %145 = vector.broadcast %cst_65 : f32 to vector<4x128xf32>
    %146 = arith.addf %144, %145 : vector<4x128xf32>
    %147 = tpu.reciprocal %146 {approx = true} : vector<4x128xf32> -> vector<4x128xf32>
    %148 = arith.mulf %146, %147 : vector<4x128xf32>
    %cst_66 = arith.constant 2.000000e+00 : f32
    %149 = vector.broadcast %cst_66 : f32 to vector<4x128xf32>
    %150 = arith.subf %149, %148 : vector<4x128xf32>
    %151 = arith.mulf %147, %150 : vector<4x128xf32>
    %cst_67 = arith.constant 2.000000e+01 : f32
    %152 = vector.broadcast %cst_67 : f32 to vector<4x128xf32>
    %153 = arith.cmpf ogt, %138, %152 : vector<4x128xf32>
    %154 = arith.mulf %144, %151 : vector<4x128xf32>
    %155 = arith.mulf %138, %154 : vector<4x128xf32>
    %156 = arith.select %153, %138, %155 : vector<4x128xi1>, vector<4x128xf32>
    %c0_68 = arith.constant 0 : index
    %c0_69 = arith.constant 0 : index
    %c0_70 = arith.constant 0 : index
    %157 = vector.load %arg8[%c0_68, %c0_69, %c0_70] : memref<1x4x128xf32, #tpu.memory_space<vmem>>, vector<1x4x128xf32>
    %158 = vector.shape_cast %157 : vector<1x4x128xf32> to vector<4x128xf32>
    %159 = vector.shape_cast %156 : vector<4x128xf32> to vector<1x4x128xf32>
    tpu.vector_store %arg8[%c0_68, %c0_69, %c0_70], %159 {strides = array<i32>} : memref<1x4x128xf32, #tpu.memory_space<vmem>>, vector<1x4x128xf32>,
    return
  }
  func.func @transform_0(%arg0: i32, %arg1: i32) -> (i32, i32, i32) {
    %c0_i32 = arith.constant 0 : i32
    %c0_i32_0 = arith.constant 0 : i32
    return %arg0, %c0_i32, %arg1 : i32, i32, i32
  }
  func.func @transform_1(%arg0: i32, %arg1: i32) -> (i32, i32, i32, i32) {
    %c0_i32 = arith.constant 0 : i32
    %c0_i32_0 = arith.constant 0 : i32
    %c0_i32_1 = arith.constant 0 : i32
    return %arg0, %arg1, %c0_i32, %c0_i32_0 : i32, i32, i32, i32
  }
  func.func @transform_2(%arg0: i32, %arg1: i32) -> (i32, i32, i32) {
    %c0_i32 = arith.constant 0 : i32
    %c0_i32_0 = arith.constant 0 : i32
    %c0_i32_1 = arith.constant 0 : i32
    %c0_i32_2 = arith.constant 0 : i32
    return %c0_i32, %c0_i32_0, %c0_i32_1 : i32, i32, i32
  }
  func.func @transform_3(%arg0: i32, %arg1: i32) -> (i32, i32) {
    %c0_i32 = arith.constant 0 : i32
    %c0_i32_0 = arith.constant 0 : i32
    %c0_i32_1 = arith.constant 0 : i32
    return %c0_i32, %c0_i32_0 : i32, i32
  }
  func.func @transform_4(%arg0: i32, %arg1: i32) -> (i32, i32, i32) {
    %c0_i32 = arith.constant 0 : i32
    %c0_i32_0 = arith.constant 0 : i32
    %c0_i32_1 = arith.constant 0 : i32
    %c0_i32_2 = arith.constant 0 : i32
    return %c0_i32, %c0_i32_0, %c0_i32_1 : i32, i32, i32
  }
  func.func @transform_5(%arg0: i32, %arg1: i32) -> (i32, i32) {
    %c0_i32 = arith.constant 0 : i32
    %c0_i32_0 = arith.constant 0 : i32
    %c0_i32_1 = arith.constant 0 : i32
    return %c0_i32, %c0_i32_0 : i32, i32
  }
  func.func @transform_6(%arg0: i32, %arg1: i32) -> (i32, i32, i32) {
    %c0_i32 = arith.constant 0 : i32
    %c0_i32_0 = arith.constant 0 : i32
    return %arg0, %c0_i32, %arg1 : i32, i32, i32
  }
}

</mosaic_0001>

<bundles_post_ra>
// kernel: tpu_custom_call.1
= control target key start
LH: loop header
LB: loop body
LE: loop exit
PB: predicated region body
PF: predicated region fallthrough
CT: control target
= control target key end

     0   :  { %11 = vsyncpa [#allocation3], 0  ;;  %s1806_s0 = inlined_call_operand.vmem [shape: f32[2,4,256], index: 0, kind: input, shape index: {}]   ;;  %s1807_s1 = inlined_call_operand.vmem [shape: f32[2,2,4,4], index: 1, kind: input, shape index: {}]   ;;  %s1808_s2 = inlined_call_operand.vmem [shape: f32[3,8,4], index: 2, kind: input, shape index: {}]   ;;  %s1809_s3 = inlined_call_operand.vmem [shape: f32[8,1], index: 3, kind: input, shape index: {}]   ;;  %s1810_s4 = inlined_call_operand.vmem [shape: f32[3,4,8], index: 4, kind: input, shape index: {}]   ;;  %s1811_s5 = inlined_call_operand.vmem [shape: f32[4,1], index: 5, kind: input, shape index: {}]   ;;  %s1812_s6 = inlined_call_operand.hbm [shape: f32[2,4,256], index: 6, kind: output, shape index: {}]  }
   0x1   :  { %13 = vsyncpa [#allocation3 + $0x1], 0  ;;  %s1560_s21 = smov 0   ;;  %s1562_s22 = smov 0  }
   0x2   :  { %s1564_s23 = smov 0   ;;  %s1566_s24 = smov 0  }
   0x3   :  { %s1568_s25 = smov 0   ;;  %s1570_s26 = smov 0  }
   0x4   :  { %s1572_s27 = smov 0   ;;  %s1574_s28 = smov 0  }
   0x5 LB: > { %s1225_s29 = sadd.s32 4294967295, %s1513_s28   ;;  %s1226_s30 = sadd.s32 4294967294, %s1513_s28   ;;  %s1513_s28 = sphi %s1574_s28, %s19_s28   ;;  %s1509_s27 = sphi %s1572_s27, %s1824_s27   ;;  %s1505_s26 = sphi %s1570_s26, %s1823_s26   ;;  %s1501_s25 = sphi %s1568_s25, %s1822_s25   ;;  %s1497_s24 = sphi %s1566_s24, %s1821_s24   ;;  %s1493_s23 = sphi %s1564_s23, %s1820_s23   ;;  %s1489_s22 = sphi %s1562_s22, %s1819_s22   ;;  %s1485_s21 = sphi %s1560_s21, %s1818_s21  }
   0x6   : > { %s28_s7 = sadd.s32 1, %s1505_s26  ;;  %s31_s8 = sadd.s32 1, %s1509_s27 }
   0x7   : > { %p29_p0 = scmp.ge.s32.totalorder %s28_s7, 2  ;;  %p190_p1 = scmp.ne.s32.totalorder %s1493_s23, %s1489_s22 }
   0x8   : > { %p191_p2 = scmp.eq.s32.totalorder %s1225_s29, 3  ;;  %p196_p5 = scmp.ne.s32.totalorder %s1489_s22, %s1485_s21 }
   0x9   : > { %s1826_s7 = smov (%p29_p0, %s28_s7), 0  ;;  %s1828_s8 = smov (!%p29_p0, %s31_s8), %s1509_s27 }
   0xa   : > { %s176_s9 = ssub.s32 %s1505_s26, %s1826_s7  ;;  %p1611_p3 = por %p191_p2, %p190_p1 }
   0xb   : > { %p33_p4 = scmp.ge.s32.totalorder %s1828_s8, 2  ;;  %p197_p6 = scmp.eq.s32.totalorder %s1226_s30, 3 }
   0xc   : > { %p1229_p7 = scmp.ge.s32.totalorder %s1513_s28, 1  ;;  %p249_p9 = scmp.lt.s32.totalorder %s1513_s28, 5 }
   0xd   : > { %s1830_s8 = smov (%p33_p4, %s1828_s8), 0  ;;  %p1620_p8 = por %p197_p6, %p196_p5 }
   0xe   : > { %1815 = sst [smem:[#allocation5_spill]] %s1830_s8  ;;  %s175_s12 = ssub.s32 %s1509_s27, %s1830_s8 }
   0xf   : > { %s180_s13 = sadd.s32 1, %s1493_s23  ;;  %s177_s14 = sor.u32 %s176_s9, %s175_s12 }
  0x10   : > { %p250_p10 = pnand %p1229_p7, %p249_p9  ;;  %p178_p11 = scmp.eq.s32.totalorder %s177_s14, 0 }
  0x11   : > { %p290_p12 = scmp.lt.s32.totalorder (!%p250_p10), %s1501_s25, 1  ;;  %p292_p13 = scmp.lt.s32.totalorder (!%p250_p10), %s1497_s24, 1  ;;  %v1515_v0 = vmov (!%p250_p10), 1   ;;  %vm338_vm0 = vcmask (!%p250_p10), 1043456   ;;  %v1517_v3 = vmov (!%p250_p10), 0.0   ;;  %v1235_v4 = vld [vmem:[%s1808_s2 + $0x8] sm:$0xff] (!%p250_p10)  ;;  %v308_v9 = vlaneseq (!%p250_p10) }
  0x12   : > { %s1629_s15 = scalar_select %p178_p11, %s1493_s23, %s180_s13  }
  0x13   : > { %253 = sbr.rel (%p250_p10) target bundleno = 848 (0x350), region = 44  ;;  %1402 = vset.pattern.permute.xlu0 (!%p250_p10), %v1515_v0  ;;  %s1516_s8 = smov (!%p250_p10), 1   ;;  %1277 = vmatprep.subr.mxu0 (!%p250_p10), %v1517_v3  ;;  %vm334_vm1 = vcmask (!%p250_p10), 31744   ;;  %vm1518_vm2 = vmmov (!%p250_p10), 0   ;;  %v1519_v5 = vmov (!%p250_p10), 2   ;;  %v567_v6 = vld [vmem:[%s1809_s3] sm:$0xff] (!%p250_p10) }
  0x14   : > { %1282 = vmatprep.subr.mxu1 (!%p250_p10), %v1517_v3  ;;  %1279 = vmatprep.mubr.msk.f32.mxu0 (!%p250_p10), %vm1518_vm2, %v1517_v3  ;;  %s1522_s30 = smov (!%p250_p10), 126   ;;  %v1523_v7 = vmov (!%p250_p10), 0   ;;  %v1674_v11 = vand.u32 (!%p250_p10), 127, %v308_v9  ;;  %v331_v14 = vld [vmem:[%s1808_s2] sm:$0xff] (!%p250_p10)  ;;  %vm591_vm5 = vcmask (!%p250_p10), 7168   ;;  %v1240_v18 = vld [vmem:[%s1808_s2 + $0x10] sm:$0xff] (!%p250_p10) }
  0x15   : > { %1284 = vmatprep.mubr.msk.f32.mxu1 (!%p250_p10), %vm1518_vm2, %v1517_v3  ;;  %1405 = vset.pattern.permute.xlu1 (!%p250_p10), %v1523_v7  ;;  %p834_p0 = scmp.ne.s32.totalorder (!%p250_p10), %s1497_s24, 0  ;;  %p840_p1 = scmp.ne.s32.totalorder (!%p250_p10), %s1497_s24, 1  ;;  %vm867_vm15 = vcmask (!%p250_p10), 64512  }
  0x16   : > { %vm310_vm3 = vcmp.eq.s32.totalorder (!%p250_p10), %v1674_v11, 0  ;;  %vm311_vm4 = vcmp.eq.s32.totalorder (!%p250_p10), %v1674_v11, 127  ;;  %vm833_vm6 = vcmp.ne.s32.totalorder (!%p250_p10), %v1674_v11, 0  ;;  %vm839_vm8 = vcmp.ne.s32.totalorder (!%p250_p10), %v1674_v11, 1  ;;  %s1524_s12 = smov (!%p250_p10), [#allocation2]  }
  0x17   : > { %s1423_s13 = sshll.u32 (!%p250_p10), %s1524_s12, 4  ;;  %s1424_s13 = int_to_ptr.vmem [resolvable:$false] %s1423_s13 }
  0x1a   : > { %s291_s16 = scalar_select %p290_p12, %s1501_s25, 1 }
  0x1b   : > { %s293_s17 = scalar_select %p292_p13, %s1497_s24, 1 }
  0x1c   : > { %s1231_s18 = sshll.u32 %s291_s16, 1 }
  0x1d   : > { %s295_s19 = sadd.s32 %s1231_s18, %s293_s17  ;;  %s1520_s18 = smov 127  }
  0x1e   : > { %s1232_s20 = sshll.u32 %s295_s19, 2  ;;  %s1521_s19 = smov 2  }
  0x1f   : > { %s305_s9 = scalar_lea.vmem %s1807_s1, %s1232_s20  ;;  %s297_s14 = scalar_lea.vmem %s1806_s0, %s1232_s20 }
  0x20   : > { %v1642_v1 = vld [vmem:[%s305_s9] sm:$0xf]  ;;  %s835_s16 = scalar_select %p834_p0, 1, 0 }
  0x21   : > { %v1644_v2 = vld [vmem:[%s297_s14] sm:$0xf]  ;;  %318 = vperm.xlu0 %1402, %v1642_v1   ;;  %s841_s17 = scalar_select %p840_p1, 1, 0 }
  0x22   : > { %312 = vrot.lane.b32.xlu1 %v1644_v2, %s1516_s8  ;;  %1278 = vmatpush3.msk.msra.mxu0 %vm338_vm0, %v1644_v2  ;;  %v836_v58 = vstv %s835_s16  ;;  %s1255_s16 = sshll.u32 %s1501_s25, 1 }
  0x23   : > { %1280 = vmatmul.mubr.msk.f32.vlgmr.msra.gmra.mrb[0].mxu0 %vm334_vm1, %v1235_v4  ;;  %1287 = vmatprep.subr.mxu0 %v1517_v3  ;;  %v842_v60 = vstv %s841_s17  ;;  %vm837_vm7 = vcmp.eq.s32.totalorder %v836_v58, 1  ;;  %s1125_s17 = sadd.s32 %s1497_s24, %s1255_s16 }
  0x24   : > { %1289 = vmatprep.mubr.msk.f32.mxu0 %vm1518_vm2, %v1517_v3  ;;  %vm843_vm9 = vcmp.eq.s32.totalorder %v842_v60, 1  ;;  %vm838_vm11 = vmor %vm833_vm6, %vm837_vm7 }
  0x25   : > { %1403 = vset.pattern.permute.xlu0 %v1519_v5  ;;  %vm844_vm12 = vmor %vm839_vm8, %vm843_vm9 }
  0x26   : > { %322 = vrot.lane.b32.xlu1 %v1644_v2, %s1520_s18  ;;  %327 = vperm.xlu0 %1403, %v1642_v1   ;;  %vm845_vm13 = vmand %vm838_vm11, %vm844_vm12 }
  0x2a   : > { %597 = vrot.lane.b32.xlu1 %v1642_v1, %s1520_s18  ;;  %588 = vrot.lane.b32.xlu0 %v1644_v2, %s1521_s19  ;;  %s1256_s19 = sshll.u32 %s1125_s17, 6 }
  0x2b   : > { %1404 = vset.pattern.permute.xlu0 %v1523_v7  ;;  %s1753_s9 = scalar_lea.hbm %s1812_s6, %s1256_s19 }
  0x2e   : > { %593 = vrot.lane.b32.xlu1 %v1642_v1, %s1522_s30  ;;  %570 = vperm.xlu0 %1404, %v567_v6   ;;  %v1090_v6 = vld [vmem:[%s1811_s5] sm:$0xf] }
  0x94   : > { %v313_v8 = vpop.permute.xlu1 %312 }
  0x98   : > { %v323_v10 = vpop.permute.xlu1 %322 }
  0x9c   : > { %v598_v12 = vpop.permute.xlu1 %597 }
  0xa0   : > { %v319_v13 = vpop.permute.xlu0 %318  ;;  %v594_v16 = vpop.permute.xlu1 %593 }
  0xa1   : > { %v321_v15 = vsel %vm310_vm3, %v319_v13, %v313_v8  ;;  %v596_v20 = vsel %vm591_vm5, %v1644_v2, %v594_v16 }
  0xa2   : > { %1283 = vmatpush3.msk.msra.mxu1 %vm338_vm0, %v321_v15  ;;  %v864_v15 = vld [vmem:[%s1810_s4] sm:$0xf] }
  0xa3   : > { %1285 = vmatmul.mubr.msk.f32.vlgmr.msra.gmra.mrb[0].mxu1 %vm334_vm1, %v331_v14  ;;  %1292 = vmatprep.subr.mxu1 %v1517_v3 }
  0xa4   : > { %1293 = vmatpush3.msk.msra.mxu1 %vm338_vm0, %v598_v12  ;;  %1294 = vmatprep.mubr.msk.f32.mxu1 %vm1518_vm2, %v1517_v3  ;;  %v1249_v12 = vld [vmem:[%s1810_s4 + $0x4] sm:$0xf] }
  0xa5   : > { %v328_v17 = vpop.permute.xlu0 %327  ;;  %1302 = vmatprep.subr.mxu1 %v1517_v3 }
  0xa6   : > { %v330_v19 = vsel %vm311_vm4, %v328_v17, %v323_v10 }
  0xa7   : > { %1288 = vmatpush3.msk.msra.mxu0 %vm338_vm0, %v330_v19  ;;  %1295 = vmatmul.mubr.msk.f32.vlgmr.msra.gmra.mrb[2].mxu1 %vm334_vm1, %v1235_v4 }
  0xa8   : > { %1290 = vmatmul.mubr.msk.f32.vlgmr.msra.gmra.mrb[2].mxu0 %vm334_vm1, %v1240_v18  ;;  %1297 = vmatprep.subr.mxu0 %v1517_v3 }
  0xa9   : > { %v589_v21 = vpop.permute.xlu0 %588  ;;  %1299 = vmatprep.mubr.msk.f32.mxu0 %vm1518_vm2, %v1517_v3  ;;  %1303 = vmatpush3.msk.msra.mxu1 %vm338_vm0, %v596_v20 }
  0xaa   : > { %v592_v22 = vsel %vm591_vm5, %v1642_v1, %v589_v21  ;;  %1304 = vmatprep.mubr.msk.f32.mxu1 %vm1518_vm2, %v1517_v3  ;;  %1312 = vmatprep.subr.mxu1 %v1517_v3 }
  0xab   : > { %1298 = vmatpush3.msk.msra.mxu0 %vm338_vm0, %v592_v22  ;;  %1305 = vmatmul.mubr.msk.f32.vlgmr.msra.gmra.mrb[4].mxu1 %vm334_vm1, %v1240_v18 }
  0xac   : > { %1300 = vmatmul.mubr.msk.f32.vlgmr.msra.gmra.mrb[4].mxu0 %vm334_vm1, %v331_v14  ;;  %1307 = vmatprep.subr.mxu0 %v1517_v3 }
  0xad   : > { %1309 = vmatprep.mubr.msk.f32.mxu0 %vm1518_vm2, %v1517_v3  ;;  %1314 = vmatprep.mubr.msk.f32.mxu1 %vm1518_vm2, %v1517_v3  ;;  %v571_v29 = vpop.permute.xlu0 %570 }
  0xf6   : > { %v408_v23 = vpop.f32.mrb[0].mxu0 }
  0xf7   : > { %v1281_v24 = vpop.f32.mrb[1].mxu0 }
 0x176   : > { %v484_v25 = vpop.f32.mrb[0].mxu1 }
 0x177   : > { %v485_v26 = vadd.f32 %v484_v25, %v408_v23  ;;  %v1286_v27 = vpop.f32.mrb[1].mxu1 }
 0x17a   : > { %v667_v28 = vpop.f32.mrb[2].mxu1 }
 0x17b   : > { %v562_v30 = vpop.f32.mrb[2].mxu0  ;;  %v1296_v31 = vpop.f32.mrb[3].mxu1 }
 0x17c   : > { %v566_v32 = vadd.f32 %v562_v30, %v485_v26  ;;  %v1291_v33 = vpop.f32.mrb[3].mxu0 }
 0x17e   : > { %v573_v34 = vadd.f32 %v571_v29, %v566_v32  ;;  %v813_v35 = vpop.f32.mrb[4].mxu1 }
 0x17f   : > { %v740_v36 = vpop.f32.mrb[4].mxu0  ;;  %v1306_v37 = vpop.f32.mrb[5].mxu1 }
 0x180   : > { %v574_v38 = vmin.f32 %v573_v34, 20.0  ;;  %v741_v39 = vadd.f32 %v740_v36, %v667_v28  ;;  %v1301_v40 = vpop.f32.mrb[5].mxu0  ;;  %vm584_vm10 = vcmp.gt.f32.partialorder %v573_v34, 20.0 }
 0x182   : > { %v575_v41 = vmul.f32 1.442695, %v574_v38  ;;  %v817_v42 = vadd.f32 %v813_v35, %v741_v39 }
 0x184   : > { %1407 = vpow2.f32 %v575_v41  ;;  %v818_v43 = vadd.f32 %v817_v42, %v571_v29 }
 0x186   : > { %v819_v44 = vmin.f32 %v818_v43, 20.0  ;;  %vm829_vm14 = vcmp.gt.f32.partialorder %v818_v43, 20.0 }
 0x188   : > { %v820_v45 = vmul.f32 1.442695, %v819_v44 }
 0x18a   : > { %1409 = vpow2.f32 %v820_v45 }
 0x18e   : > { %v1408_v46 = vpop.eup %1407 }
 0x18f   : > { %v577_v47 = vadd.f32 2.0, %v1408_v46 }
 0x191   : > { %v578_v48 = vmul.f32 %v1408_v46, %v577_v47 }
 0x193   : > { %v579_v49 = vadd.f32 2.0, %v578_v48 }
 0x194   : > { %v1410_v50 = vpop.eup %1409 }
 0x195   : > { %1411 = vrcp.f32 %v579_v49  ;;  %v822_v51 = vadd.f32 2.0, %v1410_v50 }
 0x197   : > { %v823_v52 = vmul.f32 %v1410_v50, %v822_v51 }
 0x199   : > { %v824_v53 = vadd.f32 2.0, %v823_v52 }
 0x19b   : > { %1413 = vrcp.f32 %v824_v53 }
 0x19f   : > { %v1412_v54 = vpop.eup %1411 }
 0x1a0   : > { %v581_v55 = vmul.f32 %v1412_v54, %v579_v49 }
 0x1a2   : > { %v582_v56 = vsub.f32 2.0, %v581_v55 }
 0x1a4   : > { %v583_v57 = vmul.f32 %v1412_v54, %v582_v56 }
 0x1a5   : > { %v1414_v59 = vpop.eup %1413 }
 0x1a6   : > { %v585_v61 = vmul.f32 %v583_v57, %v578_v48  ;;  %v826_v62 = vmul.f32 %v1414_v59, %v824_v53 }
 0x1a8   : > { %v586_v63 = vmul.f32 %v585_v61, %v573_v34  ;;  %v827_v1 = vsub.f32 2.0, %v826_v62 }
 0x1aa   : > { %v587_v4 = vsel %vm584_vm10, %v573_v34, %v586_v63  ;;  %v828_v5 = vmul.f32 %v1414_v59, %v827_v1 }
 0x1ab   : > { %849 = vrot.lane.b32.xlu0 %v587_v4, %s1516_s8  ;;  %1308 = vmatpush3.msra.mxu0 %v587_v4 }
 0x1ac   : > { %v830_v7 = vmul.f32 %v828_v5, %v823_v52  ;;  %1317 = vmatprep.subr.mxu0 %v1517_v3  ;;  %1310 = vmatmul.mubr.msk.f32.vlgmr.msra.gmra.mrb[6].mxu0 %vm867_vm15, %v1249_v12 }
 0x1ad   : > { %1319 = vmatprep.mubr.msk.f32.mxu0 %vm1518_vm2, %v1517_v3  ;;  %v1252_v3 = vld [vmem:[%s1810_s4 + $0x8] sm:$0xf] }
 0x1ae   : > { %v831_v8 = vmul.f32 %v830_v7, %v818_v43 }
 0x1af   : > { %1093 = vperm.xlu0 %1404, %v1090_v6  }
 0x1b0   : > { %v832_v9 = vsel %vm829_vm14, %v818_v43, %v831_v8 }
 0x1b1   : > { %v848_v10 = vsel %vm845_vm13, %v832_v9, 0.0 }
 0x1b2   : > { %853 = vperm.xlu1 %1405, %v848_v10  }
 0x1b6   : > { %1406 = vset.pattern.permute.xlu1 %v1515_v0 }
 0x1b7   : > { %860 = vperm.xlu1 %1406, %v848_v10  }
 0x1bb   : > { %857 = vrot.lane.b32.xlu1 %v587_v4, %s1520_s18  ;;  %s287_s18 = sand.u32 1, %s1489_s22  }
 0x1bc   : > { %s1230_s14 = sshll.u32 %s287_s18, 2  ;;  %s1114_s24 = scalar_lea.sflag [#allocation3], %s287_s18 }
 0x1bd   : > { %s289_s20 = scalar_lea.vmem [#allocation2], %s1230_s14  ;;  %s1425_s14 = scalar_lea.vmem %s1424_s13, 128 }
 0x1be   : > { %s1129_s29 = sshll.u32 %s289_s20, 4  ;;  %s1755_s29 = int_to_ptr.vmem [resolvable:$true] %s1129_s29 }
 0x1bf   : > { %s1419_s25 = scalar_lea.vmem %s1755_s29, 64  ;;  %p1426_p6 = scmp.lt.s32.totalorder %s1755_s29, %s1424_s13 }
 0x1c0   : > { %p1420_p2 = scmp.ne.s32.totalorder %s1755_s29, %s1419_s25  ;;  %p1427_p7 = scmp.lt.s32.totalorder %s1425_s14, %s1419_s25 }
 0x1c2   : > { %p1421_p4 = pnand %p1420_p2, %p1611_p3  ;;  %p1428_p9 = por %p1427_p7, %p1426_p6 }
 0x1c4   : > { %p1422_p5 = pneg %p1421_p4 }
 0x1c6   : > { %p1429_p10 = pnand %p1428_p9, %p1422_p5 }
 0x21d   : > { %v850_v13 = vpop.permute.xlu0 %849 }
 0x22e   : > { %v1094_v27 = vpop.permute.xlu0 %1093 }
 0x231   : > { %v854_v14 = vpop.permute.xlu1 %853 }
 0x232   : > { %v856_v0 = vsel %vm310_vm3, %v854_v14, %v850_v13 }
 0x233   : > { %1313 = vmatpush3.msra.mxu1 %v856_v0 }
 0x234   : > { %1315 = vmatmul.mubr.msk.f32.vlgmr.msra.gmra.mrb[6].mxu1 %vm867_vm15, %v864_v15 }
 0x236   : > { %v861_v16 = vpop.permute.xlu1 %860 }
 0x23a   : > { %v858_v17 = vpop.permute.xlu1 %857 }
 0x23b   : > { %v863_v18 = vsel %vm311_vm4, %v861_v16, %v858_v17 }
 0x23c   : > { %1318 = vmatpush3.msra.mxu0 %v863_v18 }
 0x23d   : > { %1320 = vmatmul.mubr.msk.f32.vlgmr.msra.gmra.mrb[8].mxu0 %vm867_vm15, %v1252_v3 }
 0x27f   : > { %v937_v19 = vpop.f32.mrb[6].mxu0 }
 0x280   : > { %v1311_v20 = vpop.f32.mrb[7].mxu0 }
 0x307   : > { %v1010_v21 = vpop.f32.mrb[6].mxu1 }
 0x308   : > { %v1011_v22 = vadd.f32 %v1010_v21, %v937_v19  ;;  %v1316_v23 = vpop.f32.mrb[7].mxu1 }
 0x310   : > { %v1085_v24 = vpop.f32.mrb[8].mxu0 }
 0x311   : > { %v1089_v25 = vadd.f32 %v1085_v24, %v1011_v22  ;;  %v1321_v26 = vpop.f32.mrb[9].mxu0 }
 0x313   : > { %v1096_v28 = vadd.f32 %v1094_v27, %v1089_v25 }
 0x315   : > { %v1097_v29 = vadd.f32 %v1096_v28, %v1644_v2 }
 0x317   : > { %v1098_v11 = vmin.f32 %v1097_v29, 20.0  ;;  %vm1108_vm0 = vcmp.gt.f32.partialorder %v1097_v29, 20.0 }
 0x319   : > { %v1099_v30 = vmul.f32 1.442695, %v1098_v11 }
 0x31b   : > { %1415 = vpow2.f32 %v1099_v30 }
 0x325   : > { %v1416_v31 = vpop.eup %1415 }
 0x326   : > { %v1101_v32 = vadd.f32 2.0, %v1416_v31 }
 0x328   : > { %v1102_v33 = vmul.f32 %v1416_v31, %v1101_v32 }
 0x32a   : > { %v1103_v34 = vadd.f32 2.0, %v1102_v33 }
 0x32c   : > { %1417 = vrcp.f32 %v1103_v34 }
 0x336   : > { %v1418_v35 = vpop.eup %1417 }
 0x337   : > { %v1105_v36 = vmul.f32 %v1418_v35, %v1103_v34 }
 0x339   : > { %v1106_v37 = vsub.f32 2.0, %v1105_v36 }
 0x33b   : > { %v1107_v38 = vmul.f32 %v1418_v35, %v1106_v37 }
 0x33d   : > { %v1109_v39 = vmul.f32 %v1107_v38, %v1102_v33 }
 0x33f   : > { %v1110_v2 = vmul.f32 %v1109_v39, %v1097_v29 }
 0x341   : > { %v1111_v40 = vsel %vm1108_vm0, %v1097_v29, %v1110_v2 }
 0x342   : > { %1112 = vst [vmem:[%s289_s20] sm:$0xf] %v1111_v40 }
 0x343   : > { %1432 = shalt.err (!%p1429_p10)
}
 0x344   : > { %s1433_s18 = scalar_lea.hbm %s1753_s9, 64  ;;  %s1437_s19 = scalar_lea.hbm %s1812_s6, 256 }
 0x345   : > { %p1434_p11 = scmp.ne.s32.totalorder %s1753_s9, %s1433_s18  ;;  %p1438_p0 = scmp.lt.u32.totalorder %s1753_s9, %s1812_s6 }
 0x346   : > { %p1439_p1 = scmp.lt.u32.totalorder %s1437_s19, %s1433_s18  ;;  %p1441_p4 = scmp.lt.u32.totalorder %s1433_s18, %s1753_s9 }
 0x347   : > { %p1435_p12 = pnand %p1434_p11, %p1611_p3 }
 0x348   : > { %p1440_p2 = por %p1439_p1, %p1438_p0 }
 0x349   : > { %p1436_p13 = pneg %p1435_p12 }
 0x34a   : > { %p1442_p5 = por %p1441_p4, %p1440_p2 }
 0x34c   : > { %p1443_p6 = pnand %p1442_p5, %p1436_p13 }
 0x34e   : > { %1446 = shalt.err (!%p1443_p6)
}
 0x34f   : > { %1322 = dma.vmem_to_hbm [thread:$0]  (%p1611_p3), %s1755_s29, 64, %s1753_s9, %s1114_s24  }
 0x350 PF: > { %p1328_p7 = scmp.ge.s32.totalorder %s1513_s28, 2  ;;  %s1141_s30 = sand.u32 1, %s1485_s21  }
 0x351   : > { %s1142_s25 = scalar_lea.sflag [#allocation3], %s1141_s30 }
 0x352   : > { %p1325_p9 = pnand %p1328_p7, %p1620_p8 }
 0x354   : > { %1480 = dma.done.wait (!%p1325_p9), %s1142_s25, 64  }
 0x355   : > { %1482 = vsyncadd (!%p1325_p9), %s1142_s25, 4294967232  ;;  %s19_s28 = sadd.s32 1, %s1513_s28   ;;  %s1817_s10 = sld [smem:[#allocation5_spill]] }
 0x356   : > { %p16_p10 = scmp.ge.s32.totalorder %s19_s28, 6   ;;  %s1818_s21 = smov %s1489_s22 }
 0x357   : > { %s1819_s22 = smov %s1493_s23  ;;  %s1820_s23 = smov %s1629_s15 }
 0x358   : > { %s1821_s24 = smov %s1505_s26  ;;  %s1822_s25 = smov %s1509_s27 }
 0x359   : > { %s1823_s26 = smov %s1826_s7  ;;  %18 = sbr.rel (!%p16_p10) target bundleno = 5 (0x5), region = 86 }
 0x35b   : > { %s1824_s27 = smov %s1817_s10 }
 0x360   :  { %1147 = vsyncpa [#allocation3], 1 }
 0x361   :  { %1149 = vsyncpa [#allocation3 + $0x1], 1 }

</bundles_post_ra>
